<compile_context>
chip_gen: v7x
topology: tpu7x:2x2x1
jax: 0.10.0
libtpu: 0.0.40
codegen_flags: <defaults>
</compile_context>

<pallas_src>
import functools
import math

import jax
import jax.numpy as jnp
from jax import lax
from jax.experimental import pallas as pl
from jax.experimental.pallas import tpu as pltpu


def _mha_core_kernel(*refs, kv_len, has_bias, needs_pad_mask):
    """One grid step = (batch b, head-group hg, query tile qi).

    refs = ([bias_ref,] q_ref, k_ref, v_ref, o_ref)
      bias_ref: (1, 1|G, TQ, S_pad) f32 additive mask bias ({0, -1e20})
      q_ref:    (1, G, TQ,    D) bf16  (1/sqrt(E) already folded into Wq)
      k_ref:    (1, G, S_pad, D) bf16
      v_ref:    (1, G, S_pad, D) bf16
      o_ref:    (1, G, TQ,    D) bf16  per-head attention output
    """
    if has_bias:
        bias_ref, q_ref, k_ref, v_ref, o_ref = refs
    else:
        q_ref, k_ref, v_ref, o_ref = refs

    q = q_ref[0]          # (G, TQ,    D) bf16
    k = k_ref[0]          # (G, S_pad, D) bf16
    v = v_ref[0]          # (G, S_pad, D) bf16

    # Scaled QK^T, batched over the G heads of this group; contraction on the
    # last dims -> no in-kernel transpose. f32 accumulation on the MXU.
    energy = lax.dot_general(
        q, k, dimension_numbers=(((2,), (2,)), ((0,), (0,))),
        preferred_element_type=jnp.float32)               # (G, TQ, S_pad)

    if has_bias:
        # Additive {0, -1e20} bias (already includes key-padding columns).
        energy = energy + bias_ref[0]                      # broadcasts if GB==1
    elif needs_pad_mask:
        # No user mask, but the key axis was padded: mask the pad columns.
        col = lax.broadcasted_iota(jnp.int32, energy.shape, 2)
        energy = jnp.where(col >= kv_len, jnp.float32(-1e20), energy)

    # Numerically-stable softmax over the key axis (f32).
    m = jnp.max(energy, axis=-1, keepdims=True)
    p = jnp.exp(energy - m)
    denom = jnp.sum(p, axis=-1, keepdims=True)
    attn = p * pl.reciprocal(denom, approx=True)           # EUP slot

    # attention @ V (batched over heads), f32 accumulation, bf16 store.
    out = lax.dot_general(
        attn.astype(jnp.bfloat16), v,
        dimension_numbers=(((2,), (1,)), ((0,), (0,))),
        preferred_element_type=jnp.float32)                # (G, TQ, D)

    o_ref[0] = out.astype(o_ref.dtype)


def self_attention(values, keys, queries, mask, params, *, embed_size, heads):
    """values/keys/queries: (B, S, E) float32.
    mask: None or an array broadcastable to (B, heads, S, S).
    params = (Wv, Wk, Wq, Wo, bo) in torch nn.Linear layout (out, in)."""
    B, S, E = queries.shape
    assert E == embed_size and embed_size % heads == 0
    H = heads
    D = embed_size // heads

    wv, wk, wq, wo, bo = params
    scale = 1.0 / math.sqrt(embed_size)

    # ---- input projections: full-width XLA GEMMs (bf16 MXU, f32 acc);
    # scale folded into Wq; laid out head-major (B, H, S, D) for the kernel.
    def project(x, w, fold_scale=False):
        w_t = w.T * scale if fold_scale else w.T
        y = jnp.einsum('bse,ef->bsf', x.astype(jnp.bfloat16),
                       w_t.astype(jnp.bfloat16),
                       preferred_element_type=jnp.float32)        # (B, S, E)
        return jnp.transpose(y.reshape(B, S, H, D),
                             (0, 2, 1, 3)).astype(jnp.bfloat16)   # (B, H, S, D)

    q = project(queries, wq, fold_scale=True)
    k = project(keys, wk)
    v = project(values, wv)

    # ---- tiling: lane/sublane-aligned TQ, pad S up to a multiple of TQ.
    if S <= 128:
        TQ = ((S + 7) // 8) * 8
    else:
        TQ = 256 if S % 256 == 0 else 128
    S_pad = ((S + TQ - 1) // TQ) * TQ
    needs_pad = S_pad > S
    if needs_pad:
        pad = ((0, 0), (0, 0), (0, S_pad - S), (0, 0))
        q, k, v = jnp.pad(q, pad), jnp.pad(k, pad), jnp.pad(v, pad)

    # ---- mask -> additive {0, -1e20} bias (skipped entirely when mask is None).
    has_bias = mask is not None
    mb = mh = 1
    bias = None
    if has_bias:
        m = jnp.asarray(mask)
        m4 = m.reshape((1,) * (4 - m.ndim) + m.shape)     # (b?, h?, S, S)
        mb = B if m4.shape[0] != 1 else 1
        mh = H if m4.shape[1] != 1 else 1
        keep = jnp.broadcast_to(m4 != 0, (mb, mh, S, S))
        bias = jnp.where(keep, 0.0, -1e20).astype(jnp.float32)
        if needs_pad:
            bias = jnp.pad(bias, ((0, 0), (0, 0), (0, S_pad - S), (0, 0)))
            bias = jnp.pad(bias, ((0, 0), (0, 0), (0, 0), (0, S_pad - S)),
                           constant_values=-1e20)

    # ---- generation-aware VMEM budget and head-group size G.
    try:
        vmem_cap = getattr(pltpu.get_tpu_info(), "vmem_capacity_bytes",
                           128 * 1024 * 1024)
    except Exception:   # e.g. interpret mode off-TPU
        vmem_cap = 128 * 1024 * 1024
    vmem_limit = int(vmem_cap * 0.85)

    def est_bytes(g):
        gb = g if (has_bias and mh > 1) else 1
        kv_buf = 2 * 2 * g * S_pad * D * 2              # K,V double-buffered bf16
        q_buf = 2 * g * TQ * D * 2                      # Q double-buffered bf16
        o_buf = 2 * g * TQ * D * 2                      # out double-buffered bf16
        b_buf = (2 * gb * TQ * S_pad * 4) if has_bias else 0
        temps = 3 * g * TQ * S_pad * 4                  # energy / p / attn f32
        return kv_buf + q_buf + o_buf + b_buf + temps

    G = 1
    for cand in [d for d in range(H, 0, -1) if H % d == 0]:
        if est_bytes(cand) <= int(vmem_limit * 0.7):
            G = cand
            break
    # TODO(synk): flash-style Sk tiling for very long S where even G=1 is too big.

    HG = H // G
    NQ = S_pad // TQ
    GB = G if (has_bias and mh > 1) else 1

    kernel = functools.partial(_mha_core_kernel, kv_len=S,
                               has_bias=has_bias, needs_pad_mask=needs_pad)

    in_specs = []
    inputs = []
    if has_bias:
        in_specs.append(pl.BlockSpec(
            (1, GB, TQ, S_pad),
            lambda b, hg, qi: (b if mb > 1 else 0,
                               hg if mh > 1 else 0, qi, 0)))
        inputs.append(bias)
    in_specs += [
        pl.BlockSpec((1, G, TQ, D), lambda b, hg, qi: (b, hg, qi, 0)),      # Q
        pl.BlockSpec((1, G, S_pad, D), lambda b, hg, qi: (b, hg, 0, 0)),    # K
        pl.BlockSpec((1, G, S_pad, D), lambda b, hg, qi: (b, hg, 0, 0)),    # V
    ]
    inputs += [q, k, v]

    attn_out = pl.pallas_call(
        kernel,
        out_shape=jax.ShapeDtypeStruct((B, H, S_pad, D), jnp.bfloat16),
        grid_spec=pltpu.PrefetchScalarGridSpec(
            num_scalar_prefetch=0,
            grid=(B, HG, NQ),        # q-tiles innermost: K/V resident across them
            in_specs=in_specs,
            out_specs=pl.BlockSpec((1, G, TQ, D),
                                   lambda b, hg, qi: (b, hg, qi, 0)),
        ),
        compiler_params=pltpu.CompilerParams(
            dimension_semantics=("parallel", "parallel", "arbitrary"),
            vmem_limit_bytes=vmem_limit,
        ),
    )(*inputs)

    # ---- merge heads + fc_out as one full-width XLA GEMM (bf16 MXU, f32 acc).
    attn_out = attn_out[:, :, :S, :]                        # drop seq padding
    wo_h = wo.T.reshape(H, D, E).astype(jnp.bfloat16)       # Wo.T grouped by head
    out = jnp.einsum('bhsd,hde->bse', attn_out, wo_h,
                     preferred_element_type=jnp.float32)
    return out + bo.astype(jnp.float32)


def _reference(values, keys, queries, mask, params, *, embed_size, heads):
    """Pure-JAX reference mirroring the PyTorch forward."""
    wv, wk, wq, wo, bo = params
    B, S, E = queries.shape
    D = embed_size // heads
    v = values @ wv.T
    k = keys @ wk.T
    q = queries @ wq.T
    v = v.reshape(B, S, heads, D)
    k = k.reshape(B, S, heads, D)
    q = q.reshape(B, S, heads, D)
    energy = jnp.einsum('nqhd,nkhd->nhqk', q, k)
    if mask is not None:
        energy = jnp.where(mask == 0, -1e20, energy)
    attn = jax.nn.softmax(energy / math.sqrt(embed_size), axis=3)
    out = jnp.einsum('nhqk,nkhd->nqhd', attn, v).reshape(B, S, heads * D)
    return out @ wo.T + bo


if __name__ == "__main__":
    B, S, E, H = 2, 8, 32, 4

    key = jax.random.PRNGKey(0)
    ks = jax.random.split(key, 8)
    values = jax.random.normal(ks[0], (B, S, E), dtype=jnp.float32)
    keys_in = jax.random.normal(ks[1], (B, S, E), dtype=jnp.float32)
    queries = jax.random.normal(ks[2], (B, S, E), dtype=jnp.float32)

    # Deterministic parameter init (torch Linear shapes: (out, in)).
    bound = 1.0 / math.sqrt(E)
    wv = jax.random.uniform(ks[3], (E, E), minval=-bound, maxval=bound, dtype=jnp.float32)
    wk = jax.random.uniform(ks[4], (E, E), minval=-bound, maxval=bound, dtype=jnp.float32)
    wq = jax.random.uniform(ks[5], (E, E), minval=-bound, maxval=bound, dtype=jnp.float32)
    wo = jax.random.uniform(ks[6], (E, E), minval=-bound, maxval=bound, dtype=jnp.float32)
    bo = jax.random.uniform(ks[7], (E,), minval=-bound, maxval=bound, dtype=jnp.float32)
    params = (wv, wk, wq, wo, bo)

    # Causal mask, kept small ((S, S)); the wrapper/reference broadcast it.
    mask = jnp.tril(jnp.ones((S, S), dtype=jnp.float32))

    out = self_attention(values, keys_in, queries, mask, params, embed_size=E, heads=H)
    out = jax.block_until_ready(out)

    # Reference in f32 on bf16-rounded inputs/weights (the kernel feeds the MXU
    # in bf16 with f32 accumulation), with a tolerance covering the remaining
    # bf16 rounding of intermediates.
    rnd = lambda x: x.astype(jnp.bfloat16).astype(jnp.float32)
    ref = _reference(rnd(values), rnd(keys_in), rnd(queries), mask,
                     (rnd(wv), rnd(wk), rnd(wq), rnd(wo), bo),
                     embed_size=E, heads=H)

    assert out.shape == (B, S, E)
    max_diff = float(jnp.max(jnp.abs(out - ref)))
    assert jnp.allclose(out, ref, atol=2e-2, rtol=2e-2), (
        f"mismatch vs reference; max abs diff = {max_diff}")

    print("KERNEL_OK")
</pallas_src>

<mosaic_0001>
module attributes {stable_mosaic.version = 11 : i64} {
  func.func @_mha_core_kernel(%arg0: i32, %arg1: i32, %arg2: i32, %arg3: memref<1x1x8x8xf32, #tpu.memory_space<vmem>>, %arg4: memref<1x4x8x8xbf16, #tpu.memory_space<vmem>>, %arg5: memref<1x4x8x8xbf16, #tpu.memory_space<vmem>>, %arg6: memref<1x4x8x8xbf16, #tpu.memory_space<vmem>>, %arg7: memref<1x4x8x8xbf16, #tpu.memory_space<vmem>>) attributes {dimension_semantics = [#tpu.dimension_semantics<parallel>, #tpu.dimension_semantics<parallel>, #tpu.dimension_semantics<arbitrary>], iteration_bounds = array<i64: 2, 1, 1>, scalar_prefetch = 0 : i64, scratch_operands = 0 : i64, tpu.core_type = #tpu.core_type<tc>, window_params = [{transform_indices = @transform_0, window_bounds = array<i64: 1, 1, 8, 8>}, {transform_indices = @transform_1, window_bounds = array<i64: 1, 4, 8, 8>}, {transform_indices = @transform_2, window_bounds = array<i64: 1, 4, 8, 8>}, {transform_indices = @transform_3, window_bounds = array<i64: 1, 4, 8, 8>}, {transform_indices = @transform_4, window_bounds = array<i64: 1, 4, 8, 8>}]} {
    %c0 = arith.constant 0 : index
    %c0_0 = arith.constant 0 : index
    %c0_1 = arith.constant 0 : index
    %c0_2 = arith.constant 0 : index
    %0 = vector.load %arg4[%c0, %c0_0, %c0_1, %c0_2] : memref<1x4x8x8xbf16, #tpu.memory_space<vmem>>, vector<1x4x8x8xbf16>
    %1 = vector.shape_cast %0 : vector<1x4x8x8xbf16> to vector<4x8x8xbf16>
    %c0_3 = arith.constant 0 : index
    %c0_4 = arith.constant 0 : index
    %c0_5 = arith.constant 0 : index
    %c0_6 = arith.constant 0 : index
    %2 = vector.load %arg5[%c0_3, %c0_4, %c0_5, %c0_6] : memref<1x4x8x8xbf16, #tpu.memory_space<vmem>>, vector<1x4x8x8xbf16>
    %3 = vector.shape_cast %2 : vector<1x4x8x8xbf16> to vector<4x8x8xbf16>
    %c0_7 = arith.constant 0 : index
    %c0_8 = arith.constant 0 : index
    %c0_9 = arith.constant 0 : index
    %c0_10 = arith.constant 0 : index
    %4 = vector.load %arg6[%c0_7, %c0_8, %c0_9, %c0_10] : memref<1x4x8x8xbf16, #tpu.memory_space<vmem>>, vector<1x4x8x8xbf16>
    %5 = vector.shape_cast %4 : vector<1x4x8x8xbf16> to vector<4x8x8xbf16>
    %cst = arith.constant dense<0.000000e+00> : vector<4x8x8xf32>
    %6 = tpu.matmul %1, %3, %cst {dimension_numbers = #tpu.dot_dimension_numbers<[2], [2], [1], [1], [0, 0, 0, 1, 1, 1], [0], [0]>} : vector<4x8x8xbf16>, vector<4x8x8xbf16>, vector<4x8x8xf32> -> vector<4x8x8xf32>
    %c0_11 = arith.constant 0 : index
    %c0_12 = arith.constant 0 : index
    %c0_13 = arith.constant 0 : index
    %c0_14 = arith.constant 0 : index
    %7 = vector.load %arg3[%c0_11, %c0_12, %c0_13, %c0_14] : memref<1x1x8x8xf32, #tpu.memory_space<vmem>>, vector<1x1x8x8xf32>
    %8 = vector.shape_cast %7 : vector<1x1x8x8xf32> to vector<1x8x8xf32>
    %9 = vector.broadcast %8 : vector<1x8x8xf32> to vector<4x8x8xf32>
    %10 = arith.addf %6, %9 : vector<4x8x8xf32>
    %cst_15 = arith.constant dense<0xFF800000> : vector<4x8xf32>
    %11 = vector.multi_reduction <maximumf>, %10, %cst_15 [2] : vector<4x8x8xf32> to vector<4x8xf32>
    %12 = vector.shape_cast %11 : vector<4x8xf32> to vector<4x8x1xf32>
    %13 = vector.broadcast %12 : vector<4x8x1xf32> to vector<4x8x8xf32>
    %14 = arith.subf %10, %13 : vector<4x8x8xf32>
    %15 = math.exp %14 : vector<4x8x8xf32>
    %cst_16 = arith.constant dense<0.000000e+00> : vector<4x8xf32>
    %16 = vector.multi_reduction <add>, %15, %cst_16 [2] : vector<4x8x8xf32> to vector<4x8xf32>
    %17 = vector.shape_cast %16 : vector<4x8xf32> to vector<4x8x1xf32>
    %18 = tpu.reciprocal %17 {approx = true} : vector<4x8x1xf32> -> vector<4x8x1xf32>
    %19 = vector.broadcast %18 : vector<4x8x1xf32> to vector<4x8x8xf32>
    %20 = arith.mulf %15, %19 : vector<4x8x8xf32>
    %21 = arith.truncf %20 : vector<4x8x8xf32> to vector<4x8x8xbf16>
    %cst_17 = arith.constant dense<0.000000e+00> : vector<4x8x8xf32>
    %22 = tpu.matmul %21, %5, %cst_17 {dimension_numbers = #tpu.dot_dimension_numbers<[2], [1], [1], [2], [0, 0, 0, 1, 1, 2], [0], [0]>} : vector<4x8x8xbf16>, vector<4x8x8xbf16>, vector<4x8x8xf32> -> vector<4x8x8xf32>
    %23 = arith.truncf %22 : vector<4x8x8xf32> to vector<4x8x8xbf16>
    %c0_18 = arith.constant 0 : index
    %c0_19 = arith.constant 0 : index
    %c0_20 = arith.constant 0 : index
    %c0_21 = arith.constant 0 : index
    %24 = vector.load %arg7[%c0_18, %c0_19, %c0_20, %c0_21] : memref<1x4x8x8xbf16, #tpu.memory_space<vmem>>, vector<1x4x8x8xbf16>
    %25 = vector.shape_cast %24 : vector<1x4x8x8xbf16> to vector<4x8x8xbf16>
    %26 = vector.shape_cast %23 : vector<4x8x8xbf16> to vector<1x4x8x8xbf16>
    tpu.vector_store %arg7[%c0_18, %c0_19, %c0_20, %c0_21], %26 {strides = array<i32>} : memref<1x4x8x8xbf16, #tpu.memory_space<vmem>>, vector<1x4x8x8xbf16>,
    return
  }
  func.func @transform_0(%arg0: i32, %arg1: i32, %arg2: i32) -> (i32, i32, i32, i32) {
    %c0_i32 = arith.constant 0 : i32
    %c0_i32_0 = arith.constant 0 : i32
    %c0_i32_1 = arith.constant 0 : i32
    %c0_i32_2 = arith.constant 0 : i32
    return %c0_i32, %c0_i32_0, %arg2, %c0_i32_1 : i32, i32, i32, i32
  }
  func.func @transform_1(%arg0: i32, %arg1: i32, %arg2: i32) -> (i32, i32, i32, i32) {
    %c0_i32 = arith.constant 0 : i32
    %c0_i32_0 = arith.constant 0 : i32
    return %arg0, %arg1, %arg2, %c0_i32 : i32, i32, i32, i32
  }
  func.func @transform_2(%arg0: i32, %arg1: i32, %arg2: i32) -> (i32, i32, i32, i32) {
    %c0_i32 = arith.constant 0 : i32
    %c0_i32_0 = arith.constant 0 : i32
    %c0_i32_1 = arith.constant 0 : i32
    return %arg0, %arg1, %c0_i32, %c0_i32_0 : i32, i32, i32, i32
  }
  func.func @transform_3(%arg0: i32, %arg1: i32, %arg2: i32) -> (i32, i32, i32, i32) {
    %c0_i32 = arith.constant 0 : i32
    %c0_i32_0 = arith.constant 0 : i32
    %c0_i32_1 = arith.constant 0 : i32
    return %arg0, %arg1, %c0_i32, %c0_i32_0 : i32, i32, i32, i32
  }
  func.func @transform_4(%arg0: i32, %arg1: i32, %arg2: i32) -> (i32, i32, i32, i32) {
    %c0_i32 = arith.constant 0 : i32
    %c0_i32_0 = arith.constant 0 : i32
    return %arg0, %arg1, %arg2, %c0_i32 : i32, i32, i32, i32
  }
}

</mosaic_0001>

<bundles_post_ra>
// kernel: tpu_custom_call.1
= control target key start
LH: loop header
LB: loop body
LE: loop exit
PB: predicated region body
PF: predicated region fallthrough
CT: control target
= control target key end

     0   :  { %s1801_s0 = inlined_call_operand.hbm [shape: f32[1,1,8,8], index: 0, kind: input, shape index: {}]   ;;  %s1802_s1 = inlined_call_operand.hbm [shape: bf16[2,4,8,8], index: 1, kind: input, shape index: {}]   ;;  %s1803_s2 = inlined_call_operand.hbm [shape: bf16[2,4,8,8], index: 2, kind: input, shape index: {}]   ;;  %s1804_s3 = inlined_call_operand.hbm [shape: bf16[2,4,8,8], index: 3, kind: input, shape index: {}]   ;;  %s1805_s4 = inlined_call_operand.hbm [shape: bf16[2,4,8,8], index: 4, kind: output, shape index: {}]  }
   0x1   :  { %1822 = sst [smem:[#allocation18_spill]] %s1802_s1 }
   0x2   :  { %1823 = sst [smem:[#allocation19_spill]] %s1803_s2 }
   0x3   :  { %9 = vsyncpa [#allocation3], 0 }
   0x4   :  { %10 = vsyncpa [#allocation6], 0 }
   0x5   :  { %12 = vsyncpa [#allocation6 + $0x1], 0 }
   0x6   :  { %13 = vsyncpa [#allocation9], 0 }
   0x7   :  { %15 = vsyncpa [#allocation9 + $0x1], 0 }
   0x8   :  { %16 = vsyncpa [#allocation4], 0 }
   0x9   :  { %18 = vsyncpa [#allocation4 + $0x1], 0  ;;  %s1420_s15 = smov 0   ;;  %s1422_s16 = smov 0  }
   0xa   :  { %s1424_s17 = smov 0   ;;  %s1426_s18 = smov 0  }
   0xb   :  { %s1428_s19 = smov 0   ;;  %s1430_s20 = smov 0  }
   0xc LB: > { %1824 = sst [smem:[#allocation15_spill]] %s1378_s19  ;;  %s43_s21 = sadd.s32 1, %s1378_s19  ;;  %s1382_s20 = sphi %s1430_s20, %s24_s20   ;;  %s1378_s19 = sphi %s1428_s19, %s1852_s19   ;;  %s1374_s18 = sphi %s1426_s18, %s1851_s18   ;;  %s1370_s17 = sphi %s1424_s17, %s1855_s17   ;;  %s1366_s16 = sphi %s1422_s16, %s1854_s16   ;;  %s1362_s15 = sphi %s1420_s15, %s1853_s15  }
   0xd   : > { %s80_s22 = sadd.s32 1, %s1370_s17  ;;  %p45_p0 = scmp.ge.s32.totalorder %s43_s21, 2 }
   0xe   : > { %p1806_p1 = scmp.ne.s32.totalorder %s1370_s17, %s1366_s16  ;;  %p88_p2 = scmp.eq.s32.totalorder %s1382_s20, 0 }
   0xf   : > { %s1857_s21 = smov (%p45_p0, %s43_s21), 0  ;;  %p1100_p5 = scmp.lt.s32.totalorder %s1382_s20, 2 }
  0x10   : > { %1825 = sst [smem:[#allocation16_spill]] %s1857_s21  ;;  %p89_p4 = por %p88_p2, %p1806_p1 }
  0x11   : > { %s73_s23 = ssub.s32 %s1378_s19, %s1857_s21  ;;  %s216_s24 = sand.u32 1, %s1382_s20  }
  0x12   : > { %p78_p6 = scmp.eq.s32.totalorder %s73_s23, 0  ;;  %s1807_s25 = sand.u32 1, %s1370_s17  }
  0x13   : > { %s1467_s26 = sshll.u32 %s1378_s19, 8  ;;  %s1474_s28 = sshll.u32 %s1807_s25, 4 }
  0x14   : > { %s1470_s27 = scalar_select %p78_p6, %s1370_s17, %s80_s22  }
  0x15   : > { %s1827_s1 = sld [smem:[#allocation18_spill]]  ;;  %p1482_p7 = pnand %p1100_p5, %p89_p4 }
  0x16   : > { %1826 = sst [smem:[#allocation17_spill]] %s1470_s27  ;;  %s220_s7 = scalar_lea.vmem [#allocation5], %s1474_s28 }
  0x17   : > { %s1828_s6 = scalar_select %p1482_p7, 1, 0 }
  0x18   : > { %s230_s8 = sshll.u32 %s220_s7, 4  ;;  %s1489_s9 = scalar_lea.sflag [#allocation6], %s216_s24  ;;  %s1487_s8 = int_to_ptr.vmem [resolvable:$true] %s230_s8 }
  0x19   : > { %p1495_p9 = pneg %p1482_p7 }
  0x1b   : > { %s1480_s5 = scalar_lea.hbm %s1827_s1, %s1467_s26  ;;  %s1179_s14 = scalar_lea.hbm %s1827_s1, 512 }
  0x1c   : > { %s1174_s10 = scalar_lea.hbm %s1480_s5, 256  ;;  %p1180_p12 = scmp.lt.u32.totalorder %s1480_s5, %s1827_s1 }
  0x1d   : > { %p1175_p8 = scmp.ne.s32.totalorder %s1480_s5, %s1174_s10  ;;  %p1181_p13 = scmp.lt.u32.totalorder %s1179_s14, %s1174_s10 }
  0x1e   : > { %s1829_s11 = scalar_select %p1495_p9, 1, 0 }
  0x1f   : > { %p1177_p10 = pnand %p1495_p9, %p1175_p8  ;;  %p1182_p0 = por %p1181_p13, %p1180_p12 }
  0x20   : > { %p1183_p2 = scmp.lt.u32.totalorder %s1174_s10, %s1480_s5 }
  0x21   : > { %p1178_p11 = pneg %p1177_p10 }
  0x22   : > { %p1184_p4 = por %p1183_p2, %p1182_p0 }
  0x24   : > { %p1185_p5 = pnand %p1184_p4, %p1178_p11 }
  0x26   : > { %1188 = shalt.err (!%p1185_p5)
}
  0x27   : > { %s1189_s24 = scalar_lea.vmem %s1487_s8, 256  ;;  %s1384_s29 = smov [#allocation5]  }
  0x28   : > { %p1190_p6 = scmp.ne.s32.totalorder %s1487_s8, %s1189_s24  ;;  %s1194_s30 = sshll.u32 %s1384_s29, 4  ;;  %s1195_s30 = int_to_ptr.vmem [resolvable:$false] %s1194_s30 }
  0x29   : > { %s1196_s7 = scalar_lea.vmem %s1195_s30, 512  ;;  %p1197_p3 = scmp.lt.s32.totalorder %s1487_s8, %s1195_s30 }
  0x2a   : > { %p1192_p8 = pnand %p1190_p6, %p1495_p9  ;;  %p1198_p1 = scmp.lt.s32.totalorder %s1196_s7, %s1189_s24 }
  0x2c   : > { %p1193_p10 = pneg %p1192_p8  ;;  %p1199_p12 = por %p1198_p1, %p1197_p3 }
  0x2e   : > { %p1200_p13 = pnand %p1199_p12, %p1193_p10 }
  0x30   : > { %1203 = shalt.err (!%p1200_p13)
}
  0x31   : > { %s1808_s10 = smov 64   ;;  %s1810_s12 = smov 4  }
  0x32   : > { %1088 = dma.hbm_to_vmem [thread:$0]  (!%p1482_p7), %s1480_s5, 256, %s1487_s8, %s1489_s9, %s1808_s10, %s1808_s10, %s1810_s12  }
  0x33   : > { %s1523_s13 = sadd.s32 4294967295, %s1382_s20   ;;  %s969_s14 = sadd.s32 4294967294, %s1382_s20  }
  0x34   : > { %p93_p1 = scmp.ne.s32.totalorder %s1366_s16, %s1362_s15  ;;  %p1814_p3 = scmp.eq.s32.totalorder %s1523_s13, 0 }
  0x35   : > { %p177_p11 = scmp.eq.s32.totalorder %s1523_s13, 1  ;;  %p183_p0 = scmp.eq.s32.totalorder %s969_s14, 1 }
  0x36   : > { %p970_p2 = scmp.ge.s32.totalorder %s1382_s20, 1  ;;  %p1533_p4 = por %p1814_p3, %p93_p1 }
  0x37   : > { %p1831_p5 = scmp.ne.s32.totalorder %s1370_s17, %s1366_s16  ;;  %p1544_p8 = por %p183_p0, %p93_p1 }
  0x38   : > { %s1830_s22 = scalar_select %p1533_p4, 1, 0 }
  0x39   : > { %p1540_p6 = por %p177_p11, %p1831_p5  ;;  %p190_p10 = scmp.lt.s32.totalorder %s1382_s20, 3 }
  0x3a   : > { %s1833_s8 = scalar_select %p1544_p8, 1, 0 }
  0x3b   : > { %s1832_s5 = scalar_select %p1540_p6, 1, 0 }
  0x3c   : > { %p1549_p12 = pnand %p970_p2, %p190_p10  ;;  %s1387_s24 = smov [#allocation2]  }
  0x3d   : > { %s205_s29 = sshll.u32 %s1387_s24, 4  ;;  %s1835_s2 = sld [smem:[#allocation19_spill]]  ;;  %s1553_s29 = int_to_ptr.vmem [resolvable:$true] %s205_s29 }
  0x3e   : > { %s1834_s23 = scalar_select %p1549_p12, 1, 0 }
  0x3f   : > { %p1081_p13 = pneg %p1549_p12  ;;  %s244_s25 = scalar_lea.vmem [#allocation7], %s1474_s28 }
  0x40   : > { %s253_s10 = sshll.u32 %s244_s25, 4  ;;  %s1570_s10 = int_to_ptr.vmem [resolvable:$true] %s253_s10 }
  0x41   : > { %p1566_p1 = pnand %p1081_p13, %p1814_p3 }
  0x43   : > { %s1561_s14 = scalar_lea.hbm %s1835_s2, %s1467_s26  ;;  %s1209_s1 = scalar_lea.hbm %s1835_s2, 512 }
  0x44   : > { %s1836_s12 = scalar_select %p1566_p1, 1, 0 }
  0x45   : > { %s1204_s24 = scalar_lea.hbm %s1561_s14, 256  ;;  %p1210_p5 = scmp.lt.u32.totalorder %s1561_s14, %s1835_s2 }
  0x46   : > { %p1205_p11 = scmp.ne.s32.totalorder %s1561_s14, %s1204_s24  ;;  %p1211_p10 = scmp.lt.u32.totalorder %s1209_s1, %s1204_s24 }
  0x47   : > { %p1213_p3 = scmp.lt.u32.totalorder %s1204_s24, %s1561_s14 }
  0x48   : > { %p1207_p0 = pnand %p1205_p11, %p1495_p9  ;;  %p1212_p13 = por %p1211_p10, %p1210_p5 }
  0x4a   : > { %p1208_p2 = pneg %p1207_p0  ;;  %p1214_p8 = por %p1213_p3, %p1212_p13 }
  0x4c   : > { %p1215_p6 = pnand %p1214_p8, %p1208_p2 }
  0x4e   : > { %1218 = shalt.err (!%p1215_p6)
}
  0x4f   : > { %s1219_s25 = scalar_lea.vmem %s1570_s10, 256  ;;  %s1388_s30 = smov [#allocation7]  }
  0x50   : > { %p1220_p11 = scmp.ne.s32.totalorder %s1570_s10, %s1219_s25  ;;  %s1224_s7 = sshll.u32 %s1388_s30, 4  ;;  %s1225_s7 = int_to_ptr.vmem [resolvable:$false] %s1224_s7 }
  0x51   : > { %s1226_s19 = scalar_lea.vmem %s1225_s7, 512  ;;  %p1227_p12 = scmp.lt.s32.totalorder %s1570_s10, %s1225_s7 }
  0x52   : > { %p1222_p0 = pnand %p1220_p11, %p1495_p9  ;;  %p1228_p1 = scmp.lt.s32.totalorder %s1226_s19, %s1219_s25 }
  0x54   : > { %p1223_p4 = pneg %p1222_p0  ;;  %p1229_p5 = por %p1228_p1, %p1227_p12 }
  0x56   : > { %p1230_p10 = pnand %p1229_p5, %p1223_p4 }
  0x58   : > { %1233 = shalt.err (!%p1230_p10)
}
  0x59   : > { %s1837_s1 = smov 4   ;;  %s1838_s21 = smov 64  }
  0x5a   : > { %1091 = dma.hbm_to_vmem [thread:$0]  (!%p1482_p7), %s1561_s14, 256, %s1570_s10, %s1489_s9, %s1838_s21, %s1838_s21, %s1837_s1  }
  0x5b   : > { %s1234_s30 = scalar_lea.hbm %s1801_s0, 128  ;;  %p1839_p4 = scmp.ne.s32.totalorder %s1836_s12, 0 }
  0x5c   : > { %p1235_p3 = scmp.ne.s32.totalorder %s1801_s0, %s1234_s30  ;;  %p1241_p1 = scmp.lt.u32.totalorder %s1234_s30, %s1801_s0 }
  0x5d   : > { %p1236_p6 = pneg %p1839_p4 }
  0x5f   : > { %p1237_p8 = pnand %p1236_p6, %p1235_p3 }
  0x61   : > { %p1238_p12 = pneg %p1237_p8 }
  0x63   : > { %p1243_p2 = pnand %p1241_p1, %p1238_p12 }
  0x65   : > { %1246 = shalt.err (!%p1243_p2)
}
  0x66   : > { %s1247_s9 = scalar_lea.vmem %s1553_s29, 128  ;;  %p1255_p5 = scmp.lt.s32.totalorder %s1553_s29, %s1553_s29 }
  0x67   : > { %p1248_p13 = scmp.ne.s32.totalorder %s1553_s29, %s1247_s9  ;;  %p1256_p10 = scmp.lt.s32.totalorder %s1247_s9, %s1247_s9 }
  0x69   : > { %p1250_p11 = pnand %p1248_p13, %p1236_p6  ;;  %p1257_p7 = por %p1256_p10, %p1255_p5 }
  0x6b   : > { %p1251_p0 = pneg %p1250_p11 }
  0x6d   : > { %p1258_p9 = pnand %p1257_p7, %p1251_p0 }
  0x6f   : > { %1261 = shalt.err (!%p1258_p9)
}
  0x70   : > { %1084 = dma.hbm_to_vmem [thread:$0]  (!%p1839_p4), %s1801_s0, 128, %s1553_s29, [#allocation3]  }
  0x71   : > { %s1622_s24 = scalar_lea.hbm %s1804_s3, %s1467_s26  ;;  %s267_s30 = scalar_lea.vmem [#allocation8], %s1474_s28 }
  0x72   : > { %s276_s12 = sshll.u32 %s267_s30, 4  ;;  %s1840_s7 = sand.u32 1, %s1370_s17   ;;  %s1625_s12 = int_to_ptr.vmem [resolvable:$true] %s276_s12 }
  0x73   : > { %s1629_s25 = scalar_lea.sflag [#allocation9], %s1840_s7  ;;  %s1262_s19 = scalar_lea.hbm %s1622_s24, 256 }
  0x74   : > { %p1263_p7 = scmp.ne.s32.totalorder %s1622_s24, %s1262_s19  ;;  %p1841_p9 = scmp.ne.s32.totalorder %s1829_s11, 0 }
  0x75   : > { %s1267_s26 = scalar_lea.hbm %s1804_s3, 512  ;;  %p1268_p6 = scmp.lt.u32.totalorder %s1622_s24, %s1804_s3 }
  0x76   : > { %p1265_p3 = pnand %p1263_p7, %p1841_p9  ;;  %p1269_p8 = scmp.lt.u32.totalorder %s1267_s26, %s1262_s19 }
  0x77   : > { %p1271_p1 = scmp.lt.u32.totalorder %s1262_s19, %s1622_s24 }
  0x78   : > { %p1266_p4 = pneg %p1265_p3  ;;  %p1270_p12 = por %p1269_p8, %p1268_p6 }
  0x7a   : > { %p1272_p2 = por %p1271_p1, %p1270_p12 }
  0x7c   : > { %p1273_p13 = pnand %p1272_p2, %p1266_p4 }
  0x7e   : > { %1276 = shalt.err (!%p1273_p13)
}
  0x7f   : > { %s1277_s28 = scalar_lea.vmem %s1625_s12, 256  ;;  %s1389_s10 = smov [#allocation8]  }
  0x80   : > { %p1278_p11 = scmp.ne.s32.totalorder %s1625_s12, %s1277_s28  ;;  %s1282_s14 = sshll.u32 %s1389_s10, 4  ;;  %s1283_s14 = int_to_ptr.vmem [resolvable:$false] %s1282_s14 }
  0x81   : > { %s1284_s30 = scalar_lea.vmem %s1283_s14, 512  ;;  %p1285_p10 = scmp.lt.s32.totalorder %s1625_s12, %s1283_s14 }
  0x82   : > { %p1280_p0 = pnand %p1278_p11, %p1841_p9  ;;  %p1286_p7 = scmp.lt.s32.totalorder %s1284_s30, %s1277_s28 }
  0x84   : > { %p1281_p5 = pneg %p1280_p0  ;;  %p1287_p3 = por %p1286_p7, %p1285_p10 }
  0x86   : > { %p1288_p6 = pnand %p1287_p3, %p1281_p5 }
  0x88   : > { %1291 = shalt.err (!%p1288_p6)
}
  0x89   : > { %p1842_p4 = scmp.ne.s32.totalorder %s1828_s6, 0  ;;  %p1843_p9 = scmp.ne.s32.totalorder %s1834_s23, 0 }
  0x8a   : > { %p1844_p8 = scmp.eq.s32.totalorder (!%p1843_p9), %s1523_s13, 0 }
  0x8b   : > { %1094 = dma.hbm_to_vmem [thread:$0]  (!%p1842_p4), %s1622_s24, 256, %s1625_s12, %s1629_s25, %s1838_s21, %s1838_s21, %s1837_s1  }
  0x8c   : > { %288 = sbr.rel (%p1843_p9) target bundleno = 937 (0x3a9), region = 36 }
  0x93   : > { %1345 = dma.done.wait (%p1844_p8), [#allocation3], 128   ;;  %p1845_p12 = pmov %p1844_p8 }
  0x94   : > { %s294_s6 = sand.u32 1, %s1523_s13   ;;  %s1664_s11 = sand.u32 1, %s1366_s16  }
  0x95   : > { %1347 = vsyncadd (%p1845_p12), [#allocation3], 4294967168  ;;  %s1667_s7 = sshll.u32 %s1664_s11, 4  ;;  %s295_s1 = scalar_lea.sflag [#allocation6], %s294_s6 }
  0x96   : > { %s1670_s21 = scalar_lea.vmem [#allocation5], %s1667_s7  ;;  %p1846_p1 = scmp.ne.s32.totalorder %s1830_s22, 0 }
  0x98   : > { %1349 = dma.done.wait (%p1846_p1), %s295_s1, 512  }
  0x99   : > { %1351 = vsyncadd (%p1846_p1), %s295_s1, 4294966784  ;;  %s307_s23 = scalar_lea.vmem [#allocation7], %s1667_s7  ;;  %s313_s13 = scalar_lea.sflag [#allocation9], %s1664_s11 }
  0x9a   : > { %s1679_s24 = scalar_lea.vmem [#allocation8], %s1667_s7 }
  0x9b   : > { %1353 = dma.done.wait (%p1846_p1), %s313_s13, 256  }
  0x9c   : > { %1355 = vsyncadd (%p1846_p1), %s313_s13, 4294967040  ;;  %v1390_v0 = vmov 0.0   ;;  %vm1391_vm0 = vmmov 0   ;;  %vm369_vm1 = vcmask 64512   ;;  %v360_v1 = vld [vmem:[%s307_s23] sm:$0xf] }
  0x9d   : > { %1021 = vmatprep.subr.bf16.mxu0 %v1390_v0  ;;  %1027 = vmatprep.subr.bf16.mxu1 %v1390_v0  ;;  %v361_v2 = vld [vmem:[%s307_s23 + $0x4] sm:$0xf]  ;;  %v374_v3 = vsel %vm369_vm1, %v360_v1, 0  ;;  %v362_v5 = vld [vmem:[%s307_s23 + $0x8] sm:$0xf]  ;;  %vm605_vm2 = vcmask 1043456  }
  0x9e   : > { %1023 = vmatprep.mubr.msk.bf16.mxu0 %vm1391_vm0, %v1390_v0  ;;  %1029 = vmatprep.mubr.msk.bf16.mxu1 %vm1391_vm0, %v1390_v0  ;;  %v420_v4 = vsel %vm369_vm1, %v361_v2, 0  ;;  %v363_v6 = vld [vmem:[%s307_s23 + $0xc] sm:$0xf]  ;;  %v356_v7 = vld [vmem:[%s1670_s21] sm:$0xf]  ;;  %v466_v9 = vsel %vm369_vm1, %v362_v5, 0 }
  0x9f   : > { %1022 = vmatpush3.bf16.xpose.msra.mxu0 %v374_v3  ;;  %1028 = vmatpush3.bf16.xpose.msra.mxu1 %v420_v4  ;;  %v357_v8 = vld [vmem:[%s1670_s21 + $0x4] sm:$0xf]  ;;  %v512_v10 = vsel %vm369_vm1, %v363_v6, 0  ;;  %v358_v11 = vld [vmem:[%s1670_s21 + $0x8] sm:$0xf]  ;;  %vm791_vm3 = vcmask 60416  }
  0xa0   : > { %1033 = vmatprep.subr.bf16.mxu0 %v1390_v0  ;;  %1039 = vmatprep.subr.bf16.mxu1 %v1390_v0  ;;  %v359_v12 = vld [vmem:[%s1670_s21 + $0xc] sm:$0xf]  ;;  %v364_v58 = vld [vmem:[%s1679_s24] sm:$0xf]  ;;  %v365_v60 = vld [vmem:[%s1679_s24 + $0x4] sm:$0xf] }
  0xa1   : > { %v368_v13 = vld [vmem:[#allocation2] sm:$0xff]  ;;  %v607_v59 = vsel %vm605_vm2, %v364_v58, 0  ;;  %v653_v61 = vsel %vm605_vm2, %v365_v60, 0  ;;  %s350_s22 = scalar_lea.vmem [#allocation10], %s1667_s7  ;;  %s1004_s25 = sshll.u32 %s1374_s18, 8 }
  0xa2   : > { %v366_v3 = vld [vmem:[%s1679_s24 + $0x8] sm:$0xf]  ;;  %s813_s12 = sshll.u32 %s350_s22, 4  ;;  %s1751_s9 = scalar_lea.hbm %s1805_s4, %s1004_s25  ;;  %s1745_s12 = int_to_ptr.vmem [resolvable:$true] %s813_s12 }
  0xa3   : > { %s797_s18 = scalar_lea.sflag [#allocation4], %s1664_s11  ;;  %s1292_s26 = scalar_lea.vmem %s1745_s12, 256 }
  0xa4   : > { %p1293_p2 = scmp.ne.s32.totalorder %s1745_s12, %s1292_s26  ;;  %p1847_p13 = scmp.ne.s32.totalorder %s1832_s5, 0 }
  0xa5   : > { %s1392_s2 = smov [#allocation10]  }
  0xa6   : > { %1024 = vmatmul.mubr.msk.bf16.vlgmr.msra.gmra.mrb[0].mxu0 %vm369_vm1, %v356_v7  ;;  %1030 = vmatmul.mubr.msk.bf16.vlgmr.msra.gmra.mrb[0].mxu1 %vm369_vm1, %v357_v8  ;;  %v699_v7 = vsel %vm605_vm2, %v366_v3, 0  ;;  %p1294_p11 = pnand %p1293_p2, %p1847_p13  ;;  %s1296_s27 = sshll.u32 %s1392_s2, 4  ;;  %s1297_s27 = int_to_ptr.vmem [resolvable:$false] %s1296_s27 }
  0xa7   : > { %1034 = vmatpush3.bf16.xpose.msra.mxu0 %v466_v9  ;;  %1040 = vmatpush3.bf16.xpose.msra.mxu1 %v512_v10  ;;  %v367_v9 = vld [vmem:[%s1679_s24 + $0xc] sm:$0xf]  ;;  %s1298_s28 = scalar_lea.vmem %s1297_s27, 512  ;;  %p1299_p5 = scmp.lt.s32.totalorder %s1745_s12, %s1297_s27 }
  0xa8   : > { %1035 = vmatprep.mubr.msk.bf16.mxu0 %vm1391_vm0, %v1390_v0  ;;  %1041 = vmatprep.mubr.msk.bf16.mxu1 %vm1391_vm0, %v1390_v0  ;;  %p1295_p0 = pneg %p1294_p11  ;;  %p1300_p10 = scmp.lt.s32.totalorder %s1298_s28, %s1292_s26 }
  0xa9   : > { %1045 = vmatprep.subr.bf16.mxu0 %v1390_v0  ;;  %1051 = vmatprep.subr.bf16.mxu1 %v1390_v0 }
  0xaa   : > { %p1301_p7 = por %p1300_p10, %p1299_p5 }
  0xac   : > { %p1302_p3 = pnand %p1301_p7, %p1295_p0 }
  0xae   : > { %1036 = vmatmul.mubr.msk.bf16.vlgmr.msra.gmra.mrb[4].mxu0 %vm369_vm1, %v358_v11  ;;  %1042 = vmatmul.mubr.msk.bf16.vlgmr.msra.gmra.mrb[4].mxu1 %vm369_vm1, %v359_v12  ;;  %v745_v12 = vsel %vm605_vm2, %v367_v9, 0 }
  0xaf   : > { %1047 = vmatprep.mubr.msk.bf16.mxu0 %vm1391_vm0, %v1390_v0  ;;  %1053 = vmatprep.mubr.msk.bf16.mxu1 %vm1391_vm0, %v1390_v0 }
  0xb0   : > { %1046 = vmatpush3.bf16.msra.mxu0 %v607_v59  ;;  %1052 = vmatpush3.bf16.msra.mxu1 %v653_v61 }
  0xb1   : > { %1057 = vmatprep.subr.bf16.mxu0 %v1390_v0  ;;  %1063 = vmatprep.subr.bf16.mxu1 %v1390_v0 }
 0x179   : > { %v410_v14 = vpop.f32.mrb[0].mxu0  ;;  %v456_v15 = vpop.f32.mrb[0].mxu1 }
 0x17a   : > { %v411_v16 = vadd.f32 %v410_v14, %v368_v13  ;;  %v1025_v17 = vpop.f32.mrb[1].mxu0  ;;  %v457_v18 = vadd.f32 %v456_v15, %v368_v13  ;;  %v1031_v19 = vpop.f32.mrb[1].mxu1 }
 0x17b   : > { %v413_v20 = vpop.f32.mrb[2].mxu0  ;;  %v459_v21 = vpop.f32.mrb[2].mxu1 }
 0x17c   : > { %v1026_v22 = vpop.f32.mrb[3].mxu0  ;;  %v554_v23 = vsel %vm369_vm1, %v411_v16, -inf  ;;  %v1032_v24 = vpop.f32.mrb[3].mxu1  ;;  %v557_v25 = vsel %vm369_vm1, %v457_v18, -inf }
 0x17d   : > { %555 = vmax.xlane.f32.xlu0 %v554_v23 }
 0x181   : > { %558 = vmax.xlane.f32.xlu0 %v557_v25  ;;  %v502_v26 = vpop.f32.mrb[4].mxu0  ;;  %v548_v27 = vpop.f32.mrb[4].mxu1 }
 0x182   : > { %v503_v28 = vadd.f32 %v502_v26, %v368_v13  ;;  %v1037_v29 = vpop.f32.mrb[5].mxu0  ;;  %v549_v30 = vadd.f32 %v548_v27, %v368_v13  ;;  %v1043_v31 = vpop.f32.mrb[5].mxu1 }
 0x183   : > { %v505_v32 = vpop.f32.mrb[6].mxu0  ;;  %v551_v33 = vpop.f32.mrb[6].mxu1 }
 0x184   : > { %v1038_v34 = vpop.f32.mrb[7].mxu0  ;;  %v560_v35 = vsel %vm369_vm1, %v503_v28, -inf  ;;  %v1044_v36 = vpop.f32.mrb[7].mxu1  ;;  %v563_v37 = vsel %vm369_vm1, %v549_v30, -inf }
 0x185   : > { %561 = vmax.xlane.f32.xlu1 %v560_v35 }
 0x189   : > { %564 = vmax.xlane.f32.xlu1 %v563_v37 }
 0x20a   : > { %v556_v38 = vpop.xlane.xlu0 %555 }
 0x20b   : > { %v566_v39 = vsub.f32 %v411_v16, %v556_v38 }
 0x20d   : > { %v570_v40 = vmul.f32 1.442695, %v566_v39 }
 0x20e   : > { %v559_v41 = vpop.xlane.xlu0 %558 }
 0x20f   : > { %1158 = vpow2.f32 %v570_v40  ;;  %v567_v42 = vsub.f32 %v457_v18, %v559_v41 }
 0x211   : > { %v572_v43 = vmul.f32 1.442695, %v567_v42 }
 0x212   : > { %v562_v44 = vpop.xlane.xlu1 %561 }
 0x213   : > { %1160 = vpow2.f32 %v572_v43  ;;  %v568_v45 = vsub.f32 %v503_v28, %v562_v44 }
 0x215   : > { %v574_v46 = vmul.f32 1.442695, %v568_v45 }
 0x216   : > { %v565_v47 = vpop.xlane.xlu1 %564 }
 0x217   : > { %1162 = vpow2.f32 %v574_v46  ;;  %v569_v48 = vsub.f32 %v549_v30, %v565_v47 }
 0x219   : > { %v1159_v49 = vpop.eup %1158  ;;  %v576_v50 = vmul.f32 1.442695, %v569_v48 }
 0x21a   : > { %v578_v51 = vsel %vm369_vm1, %v1159_v49, 0.0 }
 0x21b   : > { %1164 = vpow2.f32 %v576_v50  ;;  %579 = vadd.xlane.f32.xlu0 %v578_v51 }
 0x21d   : > { %v1161_v52 = vpop.eup %1160 }
 0x21e   : > { %v581_v53 = vsel %vm369_vm1, %v1161_v52, 0.0 }
 0x21f   : > { %582 = vadd.xlane.f32.xlu1 %v581_v53 }
 0x221   : > { %v1163_v54 = vpop.eup %1162 }
 0x222   : > { %v584_v55 = vsel %vm369_vm1, %v1163_v54, 0.0 }
 0x223   : > { %585 = vadd.xlane.f32.xlu0 %v584_v55 }
 0x225   : > { %v1165_v56 = vpop.eup %1164 }
 0x226   : > { %v587_v57 = vsel %vm369_vm1, %v1165_v56, 0.0 }
 0x227   : > { %588 = vadd.xlane.f32.xlu1 %v587_v57 }
 0x2a8   : > { %v580_v62 = vpop.xlane.xlu0 %579 }
 0x2a9   : > { %1166 = vrcp.f32 %v580_v62 }
 0x2ac   : > { %v583_v63 = vpop.xlane.xlu1 %582 }
 0x2ad   : > { %1168 = vrcp.f32 %v583_v63 }
 0x2b0   : > { %v586_v1 = vpop.xlane.xlu0 %585 }
 0x2b1   : > { %1170 = vrcp.f32 %v586_v1 }
 0x2b3   : > { %v1167_v2 = vpop.eup %1166 }
 0x2b4   : > { %v594_v4 = vmul.f32 %v1167_v2, %v1159_v49  ;;  %v589_v5 = vpop.xlane.xlu1 %588 }
 0x2b5   : > { %1172 = vrcp.f32 %v589_v5 }
 0x2b6   : > { %v598_v6 = vpack.c.bf16 %v594_v4, %v594_v4 }
 0x2b7   : > { %v1169_v8 = vpop.eup %1168 }
 0x2b8   : > { %v595_v10 = vmul.f32 %v1169_v8, %v1161_v52  ;;  %1048 = vmatmul.mubr.msk.bf16.vlgmr.msra.gmra.mrb[8].mxu0 %vm369_vm1, %v598_v6 }
 0x2b9   : > { %1058 = vmatpush3.bf16.msra.mxu0 %v699_v7  ;;  %1059 = vmatprep.mubr.msk.bf16.mxu0 %vm1391_vm0, %v1390_v0 }
 0x2ba   : > { %v599_v11 = vpack.c.bf16 %v595_v10, %v595_v10 }
 0x2bb   : > { %v1171_v13 = vpop.eup %1170 }
 0x2bc   : > { %v596_v14 = vmul.f32 %v1171_v13, %v1163_v54  ;;  %1054 = vmatmul.mubr.msk.bf16.vlgmr.msra.gmra.mrb[8].mxu1 %vm369_vm1, %v599_v11 }
 0x2bd   : > { %1064 = vmatpush3.bf16.msra.mxu1 %v745_v12  ;;  %1065 = vmatprep.mubr.msk.bf16.mxu1 %vm1391_vm0, %v1390_v0 }
 0x2be   : > { %v600_v15 = vpack.c.bf16 %v596_v14, %v596_v14 }
 0x2bf   : > { %v1173_v16 = vpop.eup %1172 }
 0x2c0   : > { %v597_v17 = vmul.f32 %v1173_v16, %v1165_v56  ;;  %1060 = vmatmul.mubr.msk.bf16.vlgmr.msra.gmra.mrb[12].mxu0 %vm369_vm1, %v600_v15 }
 0x2c2   : > { %v601_v18 = vpack.c.bf16 %v597_v17, %v597_v17 }
 0x2c4   : > { %1066 = vmatmul.mubr.msk.bf16.vlgmr.msra.gmra.mrb[12].mxu1 %vm369_vm1, %v601_v18 }
 0x38b   : > { %v643_v19 = vpop.f32.mrb[8].mxu0 }
 0x38c   : > { %v787_v20 = vpack.c.bf16 %v643_v19, %v643_v19  ;;  %v1049_v21 = vpop.f32.mrb[9].mxu0 }
 0x38d   : > { %v646_v22 = vpop.f32.mrb[10].mxu0 }
 0x38e   : > { %792 = vst.msk [vmem:[%s350_s22] sm:$0xf] %vm791_vm3, %v787_v20  ;;  %v1050_v23 = vpop.f32.mrb[11].mxu0 }
 0x38f   : > { %v689_v24 = vpop.f32.mrb[8].mxu1 }
 0x390   : > { %v788_v0 = vpack.c.bf16 %v689_v24, %v689_v24  ;;  %v1055_v25 = vpop.f32.mrb[9].mxu1 }
 0x391   : > { %v692_v26 = vpop.f32.mrb[10].mxu1 }
 0x392   : > { %793 = vst.msk [vmem:[%s350_s22 + $0x4] sm:$0xf] %vm791_vm3, %v788_v0  ;;  %v1056_v27 = vpop.f32.mrb[11].mxu1 }
 0x393   : > { %v735_v28 = vpop.f32.mrb[12].mxu0 }
 0x394   : > { %v789_v29 = vpack.c.bf16 %v735_v28, %v735_v28  ;;  %v1061_v30 = vpop.f32.mrb[13].mxu0 }
 0x395   : > { %v738_v31 = vpop.f32.mrb[14].mxu0 }
 0x396   : > { %794 = vst.msk [vmem:[%s350_s22 + $0x8] sm:$0xf] %vm791_vm3, %v789_v29  ;;  %v1062_v32 = vpop.f32.mrb[15].mxu0 }
 0x397   : > { %v781_v33 = vpop.f32.mrb[12].mxu1 }
 0x398   : > { %v790_v34 = vpack.c.bf16 %v781_v33, %v781_v33  ;;  %v1067_v35 = vpop.f32.mrb[13].mxu1 }
 0x399   : > { %v784_v36 = vpop.f32.mrb[14].mxu1 }
 0x39a   : > { %795 = vst.msk [vmem:[%s350_s22 + $0xc] sm:$0xf] %vm791_vm3, %v790_v34  ;;  %v1068_v37 = vpop.f32.mrb[15].mxu1 }
 0x39b   : > { %1305 = shalt.err (!%p1302_p3)
}
 0x39c   : > { %s1306_s10 = scalar_lea.hbm %s1751_s9, 256  ;;  %s1310_s6 = scalar_lea.hbm %s1805_s4, 512 }
 0x39d   : > { %p1307_p6 = scmp.ne.s32.totalorder %s1751_s9, %s1306_s10  ;;  %p1311_p8 = scmp.lt.u32.totalorder %s1751_s9, %s1805_s4 }
 0x39e   : > { %p1312_p12 = scmp.lt.u32.totalorder %s1310_s6, %s1306_s10  ;;  %p1314_p2 = scmp.lt.u32.totalorder %s1306_s10, %s1751_s9 }
 0x39f   : > { %p1308_p4 = pnand %p1307_p6, %p1847_p13 }
 0x3a0   : > { %p1313_p1 = por %p1312_p12, %p1311_p8 }
 0x3a1   : > { %p1309_p9 = pneg %p1308_p4 }
 0x3a2   : > { %p1315_p11 = por %p1314_p2, %p1313_p1 }
 0x3a4   : > { %p1316_p0 = pnand %p1315_p11, %p1309_p9 }
 0x3a6   : > { %1319 = shalt.err (!%p1316_p0)
}
 0x3a7   : > { %s1393_s21 = smov 64   ;;  %s1394_s23 = smov 4  }
 0x3a8   : > { %1079 = dma.vmem_to_hbm [thread:$0]  (%p1847_p13), %s1745_s12, 256, %s1751_s9, %s797_s18, %s1393_s21, %s1393_s21, %s1394_s23  }
 0x3a9 PF: > { %s828_s13 = sand.u32 1, %s1362_s15   ;;  %p1848_p5 = scmp.ne.s32.totalorder %s1833_s8, 0 }
 0x3aa   : > { %p1849_p10 = scmp.ge.s32.totalorder %s1382_s20, 2  ;;  %s829_s24 = scalar_lea.sflag [#allocation4], %s828_s13 }
 0x3ac   : > { %p1096_p7 = pnand %p1849_p10, %p1848_p5 }
 0x3ae   : > { %1357 = dma.done.wait (!%p1096_p7), %s829_s24, 256  }
 0x3af   : > { %1359 = vsyncadd (!%p1096_p7), %s829_s24, 4294967040  ;;  %s24_s20 = sadd.s32 1, %s1382_s20   ;;  %s1850_s22 = sld [smem:[#allocation17_spill]] }
 0x3b0   : > { %p21_p3 = scmp.ge.s32.totalorder %s24_s20, 4   ;;  %s1851_s18 = sld [smem:[#allocation15_spill]] }
 0x3b1   : > { %s1852_s19 = sld [smem:[#allocation16_spill]]  ;;  %s1853_s15 = smov %s1366_s16 }
 0x3b2   : > { %s1854_s16 = smov %s1370_s17  ;;  %23 = sbr.rel (!%p21_p3) target bundleno = 12 (0xc), region = 111 }
 0x3b5   : > { %s1855_s17 = smov %s1850_s22 }
 0x3b9   :  { %834 = vsyncpa [#allocation3], 1 }
 0x3ba   :  { %836 = vsyncpa [#allocation3 + $0x1], 1 }
 0x3bb   :  { %837 = vsyncpa [#allocation6], 1 }
 0x3bc   :  { %839 = vsyncpa [#allocation6 + $0x1], 1 }
 0x3bd   :  { %840 = vsyncpa [#allocation9], 1 }
 0x3be   :  { %842 = vsyncpa [#allocation9 + $0x1], 1 }
 0x3bf   :  { %843 = vsyncpa [#allocation4], 1 }
 0x3c0   :  { %845 = vsyncpa [#allocation4 + $0x1], 1 }

</bundles_post_ra>
